<compile_context>
chip_gen: v7x
topology: tpu7x:2x2x1
jax: 0.10.0
libtpu: 0.0.40
codegen_flags: <defaults>
</compile_context>

<pallas_src>
import functools
import math

import jax
import jax.numpy as jnp
from jax.experimental import pallas as pl
from jax.experimental.pallas import tpu as pltpu


def _round_up(x, m):
    return (x + m - 1) // m * m


def _flash_attn_kernel(q_ref, k_ref, v_ref, bias_ref, o_ref,
                       m_ref, l_ref, acc_ref, *, use_bias):
    """Flash attention over pre-projected per-head Q/K/V tiles.

    grid = (batch, head, q_tile, kv_tile); kv_tile is the reduction axis.
    q_ref : (1, 1, tq,  d_k) bf16, already scaled by 1/sqrt(d_k)
    k_ref : (1, 1, tkv, d_k) bf16
    v_ref : (1, 1, tkv, d_k) bf16
    bias  : (1, tkv) f32 additive key bias (0 valid / -1e30 padded)
    o_ref : (1, 1, tq,  d_k) f32 per-head context
    """
    kv = pl.program_id(3)
    n_kv = pl.num_programs(3)

    # ---- init online-softmax state once per (b, h, q_tile) ----
    @pl.when(kv == 0)
    def _():
        m_ref[...] = jnp.full(m_ref.shape, -jnp.inf, dtype=jnp.float32)
        l_ref[...] = jnp.zeros(l_ref.shape, dtype=jnp.float32)
        acc_ref[...] = jnp.zeros(acc_ref.shape, dtype=jnp.float32)

    q = q_ref[0, 0]                                   # (tq, d_k)  bf16
    k = k_ref[0, 0]                                   # (tkv, d_k) bf16

    # scores = Q K^T (contraction over d_k, no explicit transpose)
    s = jax.lax.dot_general(q, k, (((1,), (1,)), ((), ())),
                            preferred_element_type=jnp.float32)   # (tq, tkv) f32
    if use_bias:                                       # static: only when S was padded
        s = s + bias_ref[...]                          # (1, tkv) broadcast add

    # ---- online softmax (flash) ----
    m_prev = m_ref[...]
    m_new = jnp.maximum(m_prev, jnp.max(s, axis=-1, keepdims=True))
    alpha = jnp.exp(m_prev - m_new)
    p = jnp.exp(s - m_new)
    l_ref[...] = alpha * l_ref[...] + jnp.sum(p, axis=-1, keepdims=True)
    acc_ref[...] = alpha * acc_ref[...] + jnp.dot(
        p.astype(jnp.bfloat16), v_ref[0, 0], preferred_element_type=jnp.float32)
    m_ref[...] = m_new

    # ---- finalize: normalized per-head context ----
    @pl.when(kv == n_kv - 1)
    def _():
        ctx = acc_ref[...] * pl.reciprocal(l_ref[...], approx=True)
        o_ref[0, 0] = ctx.astype(o_ref.dtype)


def multihead_attention(q_sbd, k_sbd, v_sbd, params, *, heads,
                        q_tile=128, kv_tile=256):
    """q/k/v in PyTorch layout (seq, batch, d_model). Returns (seq, batch, d_model)."""
    S, B, Dm = q_sbd.shape
    assert Dm % heads == 0
    d_k = Dm // heads
    scale = 1.0 / math.sqrt(d_k)
    out_dtype = q_sbd.dtype

    # ---- tile selection (tq / tkv decoupled; retune per generation if desired) ----
    base = _round_up(S, 8)
    tq = min(q_tile, base)
    tkv = min(kv_tile, base)
    if (tkv % tq != 0) and (tq % tkv != 0):
        tkv = tq                       # keep a single S_pad valid for both tilings
    S_pad = _round_up(S, max(tq, tkv))
    nq, nkv = S_pad // tq, S_pad // tkv
    mask_keys = (S_pad != S)

    # ---- hoisted projections (XLA GEMMs): (S,B,Dm) -> (B,H,S_pad,d_k) bf16 ----
    def project(x, w, b):
        y = jnp.einsum('sbd,dhk->bhsk', x, w.reshape(Dm, heads, d_k))
        y = y + b.reshape(1, heads, 1, d_k)
        if S_pad != S:
            y = jnp.pad(y, ((0, 0), (0, 0), (0, S_pad - S), (0, 0)))
        return y.astype(jnp.bfloat16)

    # fold the 1/sqrt(d_k) softmax scale into the Q projection (free)
    qp = project(q_sbd, params["wq"] * scale, params["bq"] * scale)
    kp = project(k_sbd, params["wk"], params["bk"])
    vp = project(v_sbd, params["wv"], params["bv"])

    # additive key-padding bias (finite sentinel; only *used* when mask_keys)
    key_bias = jnp.where(jnp.arange(S_pad) < S, 0.0, -1e30).astype(
        jnp.float32).reshape(1, S_pad)

    kernel = functools.partial(_flash_attn_kernel, use_bias=mask_keys)

    ctx = pl.pallas_call(
        kernel,
        out_shape=jax.ShapeDtypeStruct((B, heads, S_pad, d_k), jnp.float32),
        grid_spec=pltpu.PrefetchScalarGridSpec(
            num_scalar_prefetch=0,
            grid=(B, heads, nq, nkv),
            in_specs=[
                pl.BlockSpec((1, 1, tq, d_k), lambda b, h, qi, kv: (b, h, qi, 0)),   # Q
                pl.BlockSpec((1, 1, tkv, d_k), lambda b, h, qi, kv: (b, h, kv, 0)),  # K
                pl.BlockSpec((1, 1, tkv, d_k), lambda b, h, qi, kv: (b, h, kv, 0)),  # V
                pl.BlockSpec((1, tkv), lambda b, h, qi, kv: (0, kv)),                # key bias
            ],
            out_specs=pl.BlockSpec((1, 1, tq, d_k), lambda b, h, qi, kv: (b, h, qi, 0)),
            scratch_shapes=[
                pltpu.VMEM((tq, 1), jnp.float32),     # running max
                pltpu.VMEM((tq, 1), jnp.float32),     # running sum
                pltpu.VMEM((tq, d_k), jnp.float32),   # context accumulator
            ],
        ),
        compiler_params=pltpu.CompilerParams(
            dimension_semantics=("parallel", "parallel", "parallel", "arbitrary"),
            vmem_limit_bytes=64 * 1024 * 1024),
    )(qp, kp, vp, key_bias)

    # ---- hoisted output projection (XLA GEMM) ----
    ctx = ctx[:, :, :S, :]                                       # (B, H, S, d_k)
    x = jnp.transpose(ctx, (2, 0, 1, 3)).reshape(S, B, Dm)       # (S, B, H*d_k)
    out = x @ params["wo"] + params["bo"][0]
    return out.astype(out_dtype)


def _reference(q_sbd, k_sbd, v_sbd, params, *, heads):
    """Pure-JAX f32 mirror of the PyTorch forward (mask=None, dropout=identity)."""
    S, B, Dm = q_sbd.shape
    d_k = Dm // heads
    scale = 1.0 / math.sqrt(d_k)

    def proj(x, w, b):
        y = x @ w + b[0]                       # (S, B, H*d_k)
        return y.reshape(S, B, heads, d_k)

    Q = proj(q_sbd, params["wq"], params["bq"])
    K = proj(k_sbd, params["wk"], params["bk"])
    V = proj(v_sbd, params["wv"], params["bv"])

    scores = jnp.einsum('ibhd,jbhd->ijbh', Q, K) * scale
    attn = jax.nn.softmax(scores, axis=1)
    x = jnp.einsum('ijbh,jbhd->ibhd', attn, V)
    x = x.reshape(S, B, Dm)
    return x @ params["wo"] + params["bo"][0]


def init_params(key, d_model):
    ks = jax.random.split(key, 8)
    s = 1.0 / math.sqrt(d_model)
    return {
        "wq": jax.random.uniform(ks[0], (d_model, d_model), jnp.float32, -s, s),
        "bq": jax.random.uniform(ks[1], (1, d_model), jnp.float32, -s, s),
        "wk": jax.random.uniform(ks[2], (d_model, d_model), jnp.float32, -s, s),
        "bk": jax.random.uniform(ks[3], (1, d_model), jnp.float32, -s, s),
        "wv": jax.random.uniform(ks[4], (d_model, d_model), jnp.float32, -s, s),
        "bv": jax.random.uniform(ks[5], (1, d_model), jnp.float32, -s, s),
        "wo": jax.random.uniform(ks[6], (d_model, d_model), jnp.float32, -s, s),
        "bo": jax.random.uniform(ks[7], (1, d_model), jnp.float32, -s, s),
    }


if __name__ == "__main__":
    heads = 4
    d_model = 32
    seq_len = 8
    batch = 2

    root = jax.random.PRNGKey(0)
    kq, kk, kv, kp = jax.random.split(root, 4)

    # PyTorch-style inputs: (seq, batch, d_model)
    q = jax.random.normal(kq, (seq_len, batch, d_model), jnp.float32)
    k = jax.random.normal(kk, (seq_len, batch, d_model), jnp.float32)
    v = jax.random.normal(kv, (seq_len, batch, d_model), jnp.float32)

    params = init_params(kp, d_model)

    out = multihead_attention(q, k, v, params, heads=heads)
    out = jax.block_until_ready(out)

    ref = _reference(q, k, v, params, heads=heads)
    assert out.shape == (seq_len, batch, d_model)
    # bf16 MXU operands with f32 accumulation -> looser tolerance than pure f32.
    assert jnp.allclose(out, ref, atol=3e-2, rtol=3e-2), (
        float(jnp.max(jnp.abs(out - ref))))

    print("KERNEL_OK")
</pallas_src>

<mosaic_0001>
module attributes {stable_mosaic.version = 11 : i64} {
  func.func @_flash_attn_kernel(%arg0: i32, %arg1: i32, %arg2: i32, %arg3: i32, %arg4: memref<1x1x8x8xbf16, #tpu.memory_space<vmem>>, %arg5: memref<1x1x8x8xbf16, #tpu.memory_space<vmem>>, %arg6: memref<1x1x8x8xbf16, #tpu.memory_space<vmem>>, %arg7: memref<1x8xf32, #tpu.memory_space<vmem>>, %arg8: memref<1x1x8x8xf32, #tpu.memory_space<vmem>>, %arg9: memref<8x1xf32, #tpu.memory_space<vmem>>, %arg10: memref<8x1xf32, #tpu.memory_space<vmem>>, %arg11: memref<8x8xf32, #tpu.memory_space<vmem>>) attributes {dimension_semantics = [#tpu.dimension_semantics<parallel>, #tpu.dimension_semantics<parallel>, #tpu.dimension_semantics<parallel>, #tpu.dimension_semantics<arbitrary>], iteration_bounds = array<i64: 2, 4, 1, 1>, scalar_prefetch = 0 : i64, scratch_operands = 3 : i64, tpu.core_type = #tpu.core_type<tc>, window_params = [{transform_indices = @transform_0, window_bounds = array<i64: 1, 1, 8, 8>}, {transform_indices = @transform_1, window_bounds = array<i64: 1, 1, 8, 8>}, {transform_indices = @transform_2, window_bounds = array<i64: 1, 1, 8, 8>}, {transform_indices = @transform_3, window_bounds = array<i64: 1, 8>}, {transform_indices = @transform_4, window_bounds = array<i64: 1, 1, 8, 8>}]} {
    %c0_i32 = arith.constant 0 : i32
    %0 = arith.cmpi eq, %arg3, %c0_i32 : i32
    %1 = arith.extui %0 : i1 to i32
    %c0_i32_0 = arith.constant 0 : i32
    %2 = arith.cmpi ne, %1, %c0_i32_0 : i32
    scf.if %2 {
      %cst_29 = arith.constant 0xFF800000 : f32
      %36 = vector.broadcast %cst_29 : f32 to vector<8x1xf32>
      %c0_30 = arith.constant 0 : index
      %c0_31 = arith.constant 0 : index
      %37 = vector.load %arg9[%c0_30, %c0_31] : memref<8x1xf32, #tpu.memory_space<vmem>>, vector<8x1xf32>
      tpu.vector_store %arg9[%c0_30, %c0_31], %36 {strides = array<i32>} : memref<8x1xf32, #tpu.memory_space<vmem>>, vector<8x1xf32>,
      %cst_32 = arith.constant 0.000000e+00 : f32
      %38 = vector.broadcast %cst_32 : f32 to vector<8x1xf32>
      %c0_33 = arith.constant 0 : index
      %c0_34 = arith.constant 0 : index
      %39 = vector.load %arg10[%c0_33, %c0_34] : memref<8x1xf32, #tpu.memory_space<vmem>>, vector<8x1xf32>
      tpu.vector_store %arg10[%c0_33, %c0_34], %38 {strides = array<i32>} : memref<8x1xf32, #tpu.memory_space<vmem>>, vector<8x1xf32>,
      %cst_35 = arith.constant 0.000000e+00 : f32
      %40 = vector.broadcast %cst_35 : f32 to vector<8x8xf32>
      %c0_36 = arith.constant 0 : index
      %c0_37 = arith.constant 0 : index
      %41 = vector.load %arg11[%c0_36, %c0_37] : memref<8x8xf32, #tpu.memory_space<vmem>>, vector<8x8xf32>
      tpu.vector_store %arg11[%c0_36, %c0_37], %40 {strides = array<i32>} : memref<8x8xf32, #tpu.memory_space<vmem>>, vector<8x8xf32>,
    } else {
    }
    %c0 = arith.constant 0 : index
    %c0_1 = arith.constant 0 : index
    %c0_2 = arith.constant 0 : index
    %c0_3 = arith.constant 0 : index
    %3 = vector.load %arg4[%c0, %c0_1, %c0_2, %c0_3] : memref<1x1x8x8xbf16, #tpu.memory_space<vmem>>, vector<1x1x8x8xbf16>
    %4 = vector.shape_cast %3 : vector<1x1x8x8xbf16> to vector<8x8xbf16>
    %c0_4 = arith.constant 0 : index
    %c0_5 = arith.constant 0 : index
    %c0_6 = arith.constant 0 : index
    %c0_7 = arith.constant 0 : index
    %5 = vector.load %arg5[%c0_4, %c0_5, %c0_6, %c0_7] : memref<1x1x8x8xbf16, #tpu.memory_space<vmem>>, vector<1x1x8x8xbf16>
    %6 = vector.shape_cast %5 : vector<1x1x8x8xbf16> to vector<8x8xbf16>
    %cst = arith.constant dense<0.000000e+00> : vector<8x8xf32>
    %7 = tpu.matmul %4, %6, %cst {dimension_numbers = #tpu.dot_dimension_numbers<[1], [1], [0], [0], [0, 0, 1, 0], [], []>} : vector<8x8xbf16>, vector<8x8xbf16>, vector<8x8xf32> -> vector<8x8xf32>
    %c0_8 = arith.constant 0 : index
    %c0_9 = arith.constant 0 : index
    %8 = vector.load %arg9[%c0_8, %c0_9] : memref<8x1xf32, #tpu.memory_space<vmem>>, vector<8x1xf32>
    %cst_10 = arith.constant dense<0xFF800000> : vector<8xf32>
    %9 = vector.multi_reduction <maximumf>, %7, %cst_10 [1] : vector<8x8xf32> to vector<8xf32>
    %10 = vector.shape_cast %9 : vector<8xf32> to vector<8x1xf32>
    %11 = arith.maximumf %8, %10 : vector<8x1xf32>
    %12 = arith.subf %8, %11 : vector<8x1xf32>
    %13 = math.exp %12 : vector<8x1xf32>
    %14 = vector.broadcast %11 : vector<8x1xf32> to vector<8x8xf32>
    %15 = arith.subf %7, %14 : vector<8x8xf32>
    %16 = math.exp %15 : vector<8x8xf32>
    %c0_11 = arith.constant 0 : index
    %c0_12 = arith.constant 0 : index
    %17 = vector.load %arg10[%c0_11, %c0_12] : memref<8x1xf32, #tpu.memory_space<vmem>>, vector<8x1xf32>
    %18 = arith.mulf %13, %17 : vector<8x1xf32>
    %cst_13 = arith.constant dense<0.000000e+00> : vector<8xf32>
    %19 = vector.multi_reduction <add>, %16, %cst_13 [1] : vector<8x8xf32> to vector<8xf32>
    %20 = vector.shape_cast %19 : vector<8xf32> to vector<8x1xf32>
    %21 = arith.addf %18, %20 : vector<8x1xf32>
    %c0_14 = arith.constant 0 : index
    %c0_15 = arith.constant 0 : index
    %22 = vector.load %arg10[%c0_14, %c0_15] : memref<8x1xf32, #tpu.memory_space<vmem>>, vector<8x1xf32>
    tpu.vector_store %arg10[%c0_14, %c0_15], %21 {strides = array<i32>} : memref<8x1xf32, #tpu.memory_space<vmem>>, vector<8x1xf32>,
    %c0_16 = arith.constant 0 : index
    %c0_17 = arith.constant 0 : index
    %23 = vector.load %arg11[%c0_16, %c0_17] : memref<8x8xf32, #tpu.memory_space<vmem>>, vector<8x8xf32>
    %24 = vector.broadcast %13 : vector<8x1xf32> to vector<8x8xf32>
    %25 = arith.mulf %24, %23 : vector<8x8xf32>
    %26 = arith.truncf %16 : vector<8x8xf32> to vector<8x8xbf16>
    %c0_18 = arith.constant 0 : index
    %c0_19 = arith.constant 0 : index
    %c0_20 = arith.constant 0 : index
    %c0_21 = arith.constant 0 : index
    %27 = vector.load %arg6[%c0_18, %c0_19, %c0_20, %c0_21] : memref<1x1x8x8xbf16, #tpu.memory_space<vmem>>, vector<1x1x8x8xbf16>
    %28 = vector.shape_cast %27 : vector<1x1x8x8xbf16> to vector<8x8xbf16>
    %cst_22 = arith.constant dense<0.000000e+00> : vector<8x8xf32>
    %29 = tpu.matmul %26, %28, %cst_22 {dimension_numbers = #tpu.dot_dimension_numbers<[1], [0], [0], [1], [0, 0, 1, 1], [], []>} : vector<8x8xbf16>, vector<8x8xbf16>, vector<8x8xf32> -> vector<8x8xf32>
    %30 = arith.addf %25, %29 : vector<8x8xf32>
    %c0_23 = arith.constant 0 : index
    %c0_24 = arith.constant 0 : index
    %31 = vector.load %arg11[%c0_23, %c0_24] : memref<8x8xf32, #tpu.memory_space<vmem>>, vector<8x8xf32>
    tpu.vector_store %arg11[%c0_23, %c0_24], %30 {strides = array<i32>} : memref<8x8xf32, #tpu.memory_space<vmem>>, vector<8x8xf32>,
    %c0_25 = arith.constant 0 : index
    %c0_26 = arith.constant 0 : index
    %32 = vector.load %arg9[%c0_25, %c0_26] : memref<8x1xf32, #tpu.memory_space<vmem>>, vector<8x1xf32>
    tpu.vector_store %arg9[%c0_25, %c0_26], %11 {strides = array<i32>} : memref<8x1xf32, #tpu.memory_space<vmem>>, vector<8x1xf32>,
    %c0_i32_27 = arith.constant 0 : i32
    %33 = arith.cmpi eq, %arg3, %c0_i32_27 : i32
    %34 = arith.extui %33 : i1 to i32
    %c0_i32_28 = arith.constant 0 : i32
    %35 = arith.cmpi ne, %34, %c0_i32_28 : i32
    scf.if %35 {
      %c0_29 = arith.constant 0 : index
      %c0_30 = arith.constant 0 : index
      %36 = vector.load %arg11[%c0_29, %c0_30] : memref<8x8xf32, #tpu.memory_space<vmem>>, vector<8x8xf32>
      %c0_31 = arith.constant 0 : index
      %c0_32 = arith.constant 0 : index
      %37 = vector.load %arg10[%c0_31, %c0_32] : memref<8x1xf32, #tpu.memory_space<vmem>>, vector<8x1xf32>
      %38 = tpu.reciprocal %37 {approx = true} : vector<8x1xf32> -> vector<8x1xf32>
      %39 = vector.broadcast %38 : vector<8x1xf32> to vector<8x8xf32>
      %40 = arith.mulf %36, %39 : vector<8x8xf32>
      %c0_33 = arith.constant 0 : index
      %c0_34 = arith.constant 0 : index
      %c0_35 = arith.constant 0 : index
      %c0_36 = arith.constant 0 : index
      %41 = vector.load %arg8[%c0_33, %c0_34, %c0_35, %c0_36] : memref<1x1x8x8xf32, #tpu.memory_space<vmem>>, vector<1x1x8x8xf32>
      %42 = vector.shape_cast %41 : vector<1x1x8x8xf32> to vector<8x8xf32>
      %43 = vector.shape_cast %40 : vector<8x8xf32> to vector<1x1x8x8xf32>
      tpu.vector_store %arg8[%c0_33, %c0_34, %c0_35, %c0_36], %43 {strides = array<i32>} : memref<1x1x8x8xf32, #tpu.memory_space<vmem>>, vector<1x1x8x8xf32>,
    } else {
    }
    return
  }
  func.func @transform_0(%arg0: i32, %arg1: i32, %arg2: i32, %arg3: i32) -> (i32, i32, i32, i32) {
    %c0_i32 = arith.constant 0 : i32
    %c0_i32_0 = arith.constant 0 : i32
    return %arg0, %arg1, %arg2, %c0_i32 : i32, i32, i32, i32
  }
  func.func @transform_1(%arg0: i32, %arg1: i32, %arg2: i32, %arg3: i32) -> (i32, i32, i32, i32) {
    %c0_i32 = arith.constant 0 : i32
    %c0_i32_0 = arith.constant 0 : i32
    return %arg0, %arg1, %arg3, %c0_i32 : i32, i32, i32, i32
  }
  func.func @transform_2(%arg0: i32, %arg1: i32, %arg2: i32, %arg3: i32) -> (i32, i32, i32, i32) {
    %c0_i32 = arith.constant 0 : i32
    %c0_i32_0 = arith.constant 0 : i32
    return %arg0, %arg1, %arg3, %c0_i32 : i32, i32, i32, i32
  }
  func.func @transform_3(%arg0: i32, %arg1: i32, %arg2: i32, %arg3: i32) -> (i32, i32) {
    %c0_i32 = arith.constant 0 : i32
    %c0_i32_0 = arith.constant 0 : i32
    return %c0_i32, %arg3 : i32, i32
  }
  func.func @transform_4(%arg0: i32, %arg1: i32, %arg2: i32, %arg3: i32) -> (i32, i32, i32, i32) {
    %c0_i32 = arith.constant 0 : i32
    %c0_i32_0 = arith.constant 0 : i32
    return %arg0, %arg1, %arg2, %c0_i32 : i32, i32, i32, i32
  }
}

</mosaic_0001>

<bundles_post_ra>
// kernel: tpu_custom_call.1
= control target key start
LH: loop header
LB: loop body
LE: loop exit
PB: predicated region body
PF: predicated region fallthrough
CT: control target
= control target key end

     0   :  { %s1423_s0 = inlined_call_operand.hbm [shape: bf16[2,4,8,8], index: 0, kind: input, shape index: {}]   ;;  %s1424_s1 = inlined_call_operand.hbm [shape: bf16[2,4,8,8], index: 1, kind: input, shape index: {}]   ;;  %s1425_s2 = inlined_call_operand.hbm [shape: bf16[2,4,8,8], index: 2, kind: input, shape index: {}]   ;;  %s1426_s3 = inlined_call_operand.hbm [shape: f32[1,8], index: 3, kind: input, shape index: {}]   ;;  %s1427_s4 = inlined_call_operand.hbm [shape: f32[2,4,8,8], index: 4, kind: output, shape index: {}]  }
   0x1   :  { %1444 = sst [smem:[#allocation26_spill]] %s1424_s1 }
   0x2   :  { %9 = vsyncpa [#allocation6], 0 }
   0x3   :  { %11 = vsyncpa [#allocation6 + $0x1], 0 }
   0x4   :  { %12 = vsyncpa [#allocation9], 0 }
   0x5   :  { %14 = vsyncpa [#allocation9 + $0x1], 0 }
   0x6   :  { %15 = vsyncpa [#allocation12], 0 }
   0x7   :  { %16 = vsyncpa [#allocation7], 0 }
   0x8   :  { %18 = vsyncpa [#allocation7 + $0x1], 0  ;;  %s1095_s15 = smov 0   ;;  %s1097_s16 = smov 0  }
   0x9   :  { %s1099_s17 = smov 0   ;;  %s1101_s18 = smov 0  }
   0xa   :  { %s1103_s19 = smov 0   ;;  %s1105_s20 = smov 0  }
   0xb   :  { %s1107_s21 = smov 0   ;;  %s1109_s22 = smov 0  }
   0xc LB: > { %1445 = sst [smem:[#allocation18_spill]] %s1031_s15  ;;  %s46_s23 = sadd.s32 1, %s1051_s20  ;;  %s1059_s22 = sphi %s1109_s22, %s24_s22   ;;  %s1055_s21 = sphi %s1107_s21, %s1479_s21   ;;  %s1051_s20 = sphi %s1105_s20, %s1478_s20   ;;  %s1047_s19 = sphi %s1103_s19, %s1477_s19   ;;  %s1043_s18 = sphi %s1101_s18, %s1476_s18   ;;  %s1039_s17 = sphi %s1099_s17, %s1475_s17   ;;  %s1035_s16 = sphi %s1097_s16, %s1481_s16   ;;  %s1031_s15 = sphi %s1095_s15, %s1480_s15  }
   0xd   : > { %1446 = sst [smem:[#allocation19_spill]] %s1039_s17  ;;  %s50_s24 = sadd.s32 1, %s1055_s21 }
   0xe   : > { %1447 = sst [smem:[#allocation20_spill]] %s1051_s20  ;;  %p48_p0 = scmp.ge.s32.totalorder %s46_s23, 4 }
   0xf   : > { %1448 = sst [smem:[#allocation21_spill]] %s1055_s21  ;;  %s61_s25 = sadd.s32 1, %s1039_s17 }
  0x10   : > { %p1428_p1 = scmp.ne.s32.totalorder %s1039_s17, %s1035_s16  ;;  %p69_p2 = scmp.eq.s32.totalorder %s1059_s22, 0 }
  0x11   : > { %s1483_s23 = smov (%p48_p0, %s46_s23), 0  ;;  %s1485_s24 = smov (!%p48_p0, %s50_s24), %s1055_s21 }
  0x12   : > { %1449 = sst [smem:[#allocation22_spill]] %s1483_s23  ;;  %s55_s26 = ssub.s32 %s1051_s20, %s1483_s23 }
  0x13   : > { %p70_p3 = por %p69_p2, %p1428_p1  ;;  %p52_p4 = scmp.ge.s32.totalorder %s1485_s24, 2 }
  0x14   : > { %p755_p5 = scmp.lt.s32.totalorder %s1059_s22, 8  ;;  %s1429_s27 = sand.u32 1, %s1039_s17  }
  0x15   : > { %s1487_s24 = smov (%p52_p4, %s1485_s24), 0  ;;  %s1155_s28 = sshll.u32 %s1429_s27, 2 }
  0x16   : > { %1450 = sst [smem:[#allocation23_spill]] %s1487_s24  ;;  %s687_s29 = sshll.u32 %s1055_s21, 2 }
  0x17   : > { %s54_s30 = ssub.s32 %s1055_s21, %s1487_s24  ;;  %s237_s5 = sadd.s32 %s1051_s20, %s687_s29 }
  0x18   : > { %s56_s6 = sor.u32 %s55_s26, %s54_s30  ;;  %s1161_s7 = sshll.u32 %s237_s5, 6 }
  0x19   : > { %p59_p6 = scmp.eq.s32.totalorder %s56_s6, 0  ;;  %p1163_p7 = pnand %p755_p5, %p70_p3 }
  0x1a   : > { %s248_s9 = sand.u32 1, %s1059_s22   ;;  %s1453_s1 = sld [smem:[#allocation26_spill]] }
  0x1b   : > { %s1451_s8 = scalar_select %p1163_p7, 1, 0 }
  0x1c   : > { %s1169_s10 = scalar_select %p59_p6, %s1039_s17, %s61_s25  }
  0x1d   : > { %s252_s14 = scalar_lea.vmem [#allocation8], %s1155_s28  ;;  %s1180_s29 = scalar_lea.sflag [#allocation9], %s248_s9 }
  0x1e   : > { %1452 = sst [smem:[#allocation24_spill]] %s1169_s10  ;;  %s262_s26 = sshll.u32 %s252_s14, 4  ;;  %s1178_s26 = int_to_ptr.vmem [resolvable:$true] %s262_s26 }
  0x1f   : > { %p1186_p9 = pneg %p1163_p7 }
  0x20   : > { %s1175_s13 = scalar_lea.hbm %s1453_s1, %s1161_s7  ;;  %s840_s11 = scalar_lea.hbm %s1453_s1, 512 }
  0x21   : > { %s835_s30 = scalar_lea.hbm %s1175_s13, 64  ;;  %p841_p12 = scmp.lt.u32.totalorder %s1175_s13, %s1453_s1 }
  0x22   : > { %p836_p8 = scmp.ne.s32.totalorder %s1175_s13, %s835_s30  ;;  %p842_p13 = scmp.lt.u32.totalorder %s840_s11, %s835_s30 }
  0x23   : > { %p844_p2 = scmp.lt.u32.totalorder %s835_s30, %s1175_s13 }
  0x24   : > { %p838_p10 = pnand %p1186_p9, %p836_p8  ;;  %p843_p0 = por %p842_p13, %p841_p12 }
  0x26   : > { %p839_p11 = pneg %p838_p10  ;;  %p845_p3 = por %p844_p2, %p843_p0 }
  0x28   : > { %p846_p4 = pnand %p845_p3, %p839_p11 }
  0x2a   : > { %849 = shalt.err (!%p846_p4)
}
  0x2b   : > { %s850_s9 = scalar_lea.vmem %s1178_s26, 64  ;;  %s1061_s5 = smov [#allocation8]  }
  0x2c   : > { %p851_p5 = scmp.ne.s32.totalorder %s1178_s26, %s850_s9  ;;  %s855_s6 = sshll.u32 %s1061_s5, 4  ;;  %s856_s6 = int_to_ptr.vmem [resolvable:$false] %s855_s6 }
  0x2d   : > { %s857_s12 = scalar_lea.vmem %s856_s6, 128  ;;  %p858_p10 = scmp.lt.s32.totalorder %s1178_s26, %s856_s6 }
  0x2e   : > { %p853_p6 = pnand %p851_p5, %p1186_p9  ;;  %p859_p1 = scmp.lt.s32.totalorder %s857_s12, %s850_s9 }
  0x30   : > { %p854_p8 = pneg %p853_p6  ;;  %p860_p12 = por %p859_p1, %p858_p10 }
  0x32   : > { %p861_p13 = pnand %p860_p12, %p854_p8 }
  0x34   : > { %864 = shalt.err (!%p861_p13)
}
  0x35   : > { %746 = dma.hbm_to_vmem [thread:$0]  (!%p1163_p7), %s1175_s13, 64, %s1178_s26, %s1180_s29  }
  0x36   : > { %s1211_s30 = sadd.s32 4294967295, %s1059_s22   ;;  %s682_s11 = sadd.s32 4294967294, %s1059_s22  }
  0x37   : > { %p74_p1 = scmp.ne.s32.totalorder %s1035_s16, %s1031_s15  ;;  %p1436_p11 = scmp.eq.s32.totalorder %s1211_s30, 0 }
  0x38   : > { %p188_p0 = scmp.eq.s32.totalorder %s1211_s30, 7  ;;  %p194_p2 = scmp.eq.s32.totalorder %s682_s11, 7 }
  0x39   : > { %p683_p3 = scmp.ge.s32.totalorder %s1059_s22, 1  ;;  %p1221_p4 = por %p1436_p11, %p74_p1 }
  0x3a   : > { %p1456_p5 = scmp.ne.s32.totalorder %s1039_s17, %s1035_s16  ;;  %p1232_p8 = por %p194_p2, %p74_p1 }
  0x3b   : > { %s1455_s14 = scalar_select %p1221_p4, 1, 0 }
  0x3c   : > { %p1228_p6 = por %p188_p0, %p1456_p5  ;;  %p201_p10 = scmp.lt.s32.totalorder %s1059_s22, 9 }
  0x3d   : > { %s1458_s26 = scalar_select %p1232_p8, 1, 0 }
  0x3e   : > { %s1457_s13 = scalar_select %p1228_p6, 1, 0 }
  0x3f   : > { %1459 = sst [smem:[#allocation25_spill]] %s1458_s26  ;;  %p1237_p12 = pnand %p683_p3, %p201_p10 }
  0x40   : > { %s1062_s5 = smov [#allocation11]   ;;  %s1249_s27 = scalar_lea.hbm %s1423_s0, %s1161_s7 }
  0x41   : > { %s1460_s9 = scalar_select %p1237_p12, 1, 0 }
  0x42   : > { %s216_s6 = sshll.u32 %s1062_s5, 4  ;;  %p736_p13 = pneg %p1237_p12  ;;  %s1241_s6 = int_to_ptr.vmem [resolvable:$true] %s216_s6 }
  0x43   : > { %s231_s1 = scalar_lea.vmem [#allocation5], %s1155_s28  ;;  %s1462_s5 = sand.u32 1, %s1039_s17  }
  0x44   : > { %s241_s24 = sshll.u32 %s231_s1, 4  ;;  %p1254_p1 = pnand %p736_p13, %p1436_p11  ;;  %s242_s24 = int_to_ptr.vmem [resolvable:$true] %s241_s24 }
  0x45   : > { %s228_s21 = scalar_lea.sflag [#allocation6], %s1462_s5  ;;  %s865_s20 = scalar_lea.hbm %s1249_s27, 64 }
  0x46   : > { %s1461_s23 = scalar_select %p1254_p1, 1, 0 }
  0x47   : > { %p866_p0 = scmp.ne.s32.totalorder %s1249_s27, %s865_s20  ;;  %s870_s10 = scalar_lea.hbm %s1423_s0, 512 }
  0x48   : > { %p871_p5 = scmp.lt.u32.totalorder %s1249_s27, %s1423_s0  ;;  %p872_p10 = scmp.lt.u32.totalorder %s870_s10, %s865_s20 }
  0x49   : > { %p868_p2 = pnand %p866_p0, %p1186_p9  ;;  %p874_p11 = scmp.lt.u32.totalorder %s865_s20, %s1249_s27 }
  0x4a   : > { %p873_p13 = por %p872_p10, %p871_p5 }
  0x4b   : > { %p869_p3 = pneg %p868_p2 }
  0x4c   : > { %p875_p8 = por %p874_p11, %p873_p13 }
  0x4e   : > { %p876_p6 = pnand %p875_p8, %p869_p3 }
  0x50   : > { %879 = shalt.err (!%p876_p6)
}
  0x51   : > { %s880_s1 = scalar_lea.vmem %s242_s24, 64  ;;  %s1063_s5 = smov [#allocation5]  }
  0x52   : > { %p881_p4 = scmp.ne.s32.totalorder %s242_s24, %s880_s1  ;;  %s885_s17 = sshll.u32 %s1063_s5, 4  ;;  %s886_s17 = int_to_ptr.vmem [resolvable:$false] %s885_s17 }
  0x53   : > { %s887_s12 = scalar_lea.vmem %s886_s17, 128  ;;  %p888_p12 = scmp.lt.s32.totalorder %s242_s24, %s886_s17 }
  0x54   : > { %p883_p0 = pnand %p881_p4, %p1186_p9  ;;  %p889_p1 = scmp.lt.s32.totalorder %s887_s12, %s880_s1 }
  0x56   : > { %p884_p2 = pneg %p883_p0  ;;  %p890_p7 = por %p889_p1, %p888_p12 }
  0x58   : > { %p891_p5 = pnand %p890_p7, %p884_p2 }
  0x5a   : > { %894 = shalt.err (!%p891_p5)
}
  0x5b   : > { %p1463_p10 = scmp.ne.s32.totalorder %s1451_s8, 0  ;;  %s895_s10 = scalar_lea.hbm %s1426_s3, 16 }
  0x5c   : > { %p896_p11 = scmp.ne.s32.totalorder %s1426_s3, %s895_s10  ;;  %p1464_p4 = scmp.ne.s32.totalorder %s1461_s23, 0 }
  0x5d   : > { %743 = dma.hbm_to_vmem [thread:$0]  (!%p1463_p10), %s1249_s27, 64, %s242_s24, %s228_s21  }
  0x5e   : > { %p897_p6 = pneg %p1464_p4  ;;  %p902_p7 = scmp.lt.u32.totalorder %s895_s10, %s1426_s3 }
  0x60   : > { %p898_p8 = pnand %p897_p6, %p896_p11 }
  0x62   : > { %p899_p3 = pneg %p898_p8 }
  0x64   : > { %p904_p12 = pnand %p902_p7, %p899_p3 }
  0x66   : > { %907 = shalt.err (!%p904_p12)
}
  0x67   : > { %s908_s21 = scalar_lea.vmem %s1241_s6, 16  ;;  %s915_s24 = scalar_lea.vmem %s1241_s6, 32 }
  0x68   : > { %p909_p1 = scmp.ne.s32.totalorder %s1241_s6, %s908_s21  ;;  %p916_p2 = scmp.lt.s32.totalorder %s1241_s6, %s1241_s6 }
  0x69   : > { %p917_p5 = scmp.lt.s32.totalorder %s915_s24, %s908_s21 }
  0x6a   : > { %p911_p13 = pnand %p909_p1, %p897_p6 }
  0x6b   : > { %p918_p11 = por %p917_p5, %p916_p2 }
  0x6c   : > { %p912_p0 = pneg %p911_p13 }
  0x6e   : > { %p919_p8 = pnand %p918_p11, %p912_p0 }
  0x70   : > { %922 = shalt.err (!%p919_p8)
}
  0x71   : > { %739 = dma.hbm_to_vmem [thread:$0]  (!%p1464_p4), %s1426_s3, 16, %s1241_s6, [#allocation12]  }
  0x72   : > { %s1303_s20 = scalar_lea.hbm %s1425_s2, %s1161_s7  ;;  %s273_s10 = scalar_lea.vmem [#allocation10], %s1155_s28 }
  0x73   : > { %s283_s26 = sshll.u32 %s273_s10, 4  ;;  %s923_s23 = scalar_lea.hbm %s1303_s20, 64  ;;  %s284_s26 = int_to_ptr.vmem [resolvable:$true] %s283_s26 }
  0x74   : > { %p924_p6 = scmp.ne.s32.totalorder %s1303_s20, %s923_s23  ;;  %s928_s6 = scalar_lea.hbm %s1425_s2, 512 }
  0x75   : > { %p929_p4 = scmp.lt.u32.totalorder %s1303_s20, %s1425_s2  ;;  %p930_p12 = scmp.lt.u32.totalorder %s928_s6, %s923_s23 }
  0x76   : > { %p926_p3 = pnand %p924_p6, %p1186_p9  ;;  %p932_p13 = scmp.lt.u32.totalorder %s923_s23, %s1303_s20 }
  0x77   : > { %p931_p1 = por %p930_p12, %p929_p4 }
  0x78   : > { %p927_p7 = pneg %p926_p3 }
  0x79   : > { %p933_p0 = por %p932_p13, %p931_p1 }
  0x7b   : > { %p934_p2 = pnand %p933_p0, %p927_p7 }
  0x7d   : > { %937 = shalt.err (!%p934_p2)
}
  0x7e   : > { %s938_s28 = scalar_lea.vmem %s284_s26, 64  ;;  %s1064_s7 = smov [#allocation10]  }
  0x7f   : > { %p939_p5 = scmp.ne.s32.totalorder %s284_s26, %s938_s28  ;;  %s943_s24 = sshll.u32 %s1064_s7, 4  ;;  %s944_s24 = int_to_ptr.vmem [resolvable:$false] %s943_s24 }
  0x80   : > { %s945_s27 = scalar_lea.vmem %s944_s24, 128  ;;  %p946_p6 = scmp.lt.s32.totalorder %s284_s26, %s944_s24 }
  0x81   : > { %p941_p11 = pnand %p939_p5, %p1186_p9  ;;  %p947_p3 = scmp.lt.s32.totalorder %s945_s27, %s938_s28 }
  0x83   : > { %p942_p8 = pneg %p941_p11  ;;  %p948_p10 = por %p947_p3, %p946_p6 }
  0x85   : > { %p949_p4 = pnand %p948_p10, %p942_p8 }
  0x87   : > { %952 = shalt.err (!%p949_p4)
}
  0x88   : > { %p1465_p12 = scmp.ne.s32.totalorder %s1451_s8, 0  ;;  %p1466_p7 = scmp.ne.s32.totalorder %s1460_s9, 0 }
  0x89   : > { %s1327_s25 = sand.u32 (!%p1466_p7), 1, %s1035_s16   ;;  %p1467_p9 = scmp.ne.s32.totalorder (!%p1466_p7), %s1455_s14, 0 }
  0x8a   : > { %749 = dma.hbm_to_vmem [thread:$0]  (!%p1465_p12), %s1303_s20, 64, %s284_s26, %s1180_s29  }
  0x8b   : > { %292 = sbr.rel (%p1466_p7) target bundleno = 971 (0x3cb), region = 36  ;;  %s1330_s5 = sshll.u32 (!%p1466_p7), %s1327_s25, 2 }
  0x8c   : > { %s295_s12 = scalar_lea.sflag (!%p1466_p7), [#allocation6], %s1327_s25  ;;  %s298_s15 = scalar_lea.vmem (!%p1466_p7), [#allocation5], %s1330_s5 }
  0x92   : > { %1014 = dma.done.wait (%p1467_p9), %s295_s12, 64  }
  0x93   : > { %1016 = vsyncadd (%p1467_p9), %s295_s12, 4294967232  ;;  %s303_s8 = sand.u32 1, %s1211_s30   ;;  %s307_s9 = scalar_lea.vmem [#allocation8], %s1330_s5 }
  0x94   : > { %s304_s29 = scalar_lea.sflag [#allocation9], %s303_s8 }
  0x95   : > { %1018 = dma.done.wait (%p1467_p9), %s304_s29, 128  }
  0x96   : > { %1020 = vsyncadd (%p1467_p9), %s304_s29, 4294967168  ;;  %s316_s20 = scalar_lea.vmem [#allocation10], %s1330_s5  ;;  %p1468_p10 = scmp.eq.s32.totalorder %s1211_s30, 0 }
  0x98   : > { %1022 = dma.done.wait (%p1468_p10), [#allocation12], 16   ;;  %p1469_p1 = pmov %p1468_p10 }
  0x99   : > { %vm363_vm0 = vcmask 64512   ;;  %v1065_v0 = vmov 0.0   ;;  %vm1066_vm1 = vmmov 0   ;;  %v366_v1 = vld [vmem:[%s307_s9] sm:$0xf]  ;;  %vm360_vm2 = vcmask 7168  }
  0x9a   : > { %1024 = vsyncadd (%p1469_p1), [#allocation12], 4294967280  ;;  %712 = vmatprep.subr.bf16.mxu0 %v1065_v0  ;;  %364 = vst.msk [vmem:[#allocation4] sm:$0xff] %vm363_vm0, %v1065_v0  ;;  %714 = vmatprep.mubr.msk.bf16.mxu0 %vm1066_vm1, %v1065_v0  ;;  %v372_v2 = vsel %vm363_vm0, %v366_v1, 0  ;;  %v365_v3 = vld [vmem:[%s298_s15] sm:$0xf] }
  0x9b   : > { %718 = vmatprep.subr.bf16.mxu1 %v1065_v0  ;;  %720 = vmatprep.mubr.msk.bf16.mxu1 %vm1066_vm1, %v1065_v0  ;;  %v1067_v4 = vmov -inf   ;;  %362 = vst.msk [vmem:[#allocation3] sm:$0xff] %vm360_vm2, %v1065_v0  ;;  %v1068_v10 = vmov 0   ;;  %v446_v15 = vld [vmem:[%s316_s20] sm:$0xf]  ;;  %vm450_vm3 = vcmask 1043456  }
  0x9c   : > { %713 = vmatpush3.bf16.xpose.msra.mxu0 %v372_v2  ;;  %361 = vst.msk [vmem:[#allocation2] sm:$0xff] %vm360_vm2, %v1067_v4  ;;  %827 = vset.pattern.permute.xlu0 %v1068_v10  ;;  %v452_v16 = vsel %vm450_vm3, %v446_v15, 0  ;;  %s700_s30 = sshll.u32 %s1327_s25, 3  ;;  %s704_s14 = sshll.u32 %s1047_s19, 2 }
  0x9d   : > { %828 = vset.pattern.permute.xlu1 %v1068_v10  ;;  %719 = vmatpush3.bf16.msra.mxu1 %v452_v16  ;;  %s523_s10 = sadd.s32 %s1043_s18, %s704_s14  ;;  %s354_s23 = scalar_lea.vmem [#allocation13], %s700_s30 }
  0x9e   : > { %s705_s26 = sshll.u32 %s523_s10, 7  ;;  %s527_s11 = sshll.u32 %s354_s23, 4  ;;  %s1370_s11 = int_to_ptr.vmem [resolvable:$true] %s527_s11 }
  0x9f   : > { %s1368_s1 = scalar_lea.hbm %s1427_s4, %s705_s26  ;;  %s511_s19 = scalar_lea.sflag [#allocation7], %s1327_s25 }
  0xa0   : > { %s953_s18 = scalar_lea.vmem %s1370_s11, 128  ;;  %p1470_p0 = scmp.ne.s32.totalorder %s1457_s13, 0 }
  0xa1   : > { %v438_v31 = vld [vmem:[#allocation4] sm:$0xff]  ;;  %p954_p13 = scmp.ne.s32.totalorder %s1370_s11, %s953_s18  ;;  %s1069_s21 = smov [#allocation13]  }
  0xa2   : > { %v430_v25 = vld [vmem:[#allocation3] sm:$0xff]  ;;  %s957_s28 = sshll.u32 %s1069_s21, 4  ;;  %s958_s28 = int_to_ptr.vmem [resolvable:$false] %s957_s28 }
  0xa3   : > { %715 = vmatmul.mubr.msk.bf16.vlgmr.msra.gmra.mrb[0].mxu0 %vm363_vm0, %v365_v3  ;;  %v414_v11 = vld [vmem:[#allocation2] sm:$0xff]  ;;  %p955_p2 = pnand %p954_p13, %p1470_p0  ;;  %s959_s7 = scalar_lea.vmem %s958_s28, 256 }
  0xa4   : > { %p960_p11 = scmp.lt.s32.totalorder %s1370_s11, %s958_s28  ;;  %p961_p8 = scmp.lt.s32.totalorder %s959_s7, %s953_s18 }
  0xa5   : > { %p956_p5 = pneg %p955_p2 }
  0xa6   : > { %p962_p6 = por %p961_p8, %p960_p11 }
  0xa8   : > { %p963_p3 = pnand %p962_p6, %p956_p5 }
 0x176   : > { %v408_v5 = vpop.f32.mrb[0].mxu0 }
 0x177   : > { %v716_v6 = vpop.f32.mrb[1].mxu0  ;;  %v415_v7 = vsel %vm363_vm0, %v408_v5, -inf }
 0x178   : > { %416 = vmax.xlane.f32.xlu0 %v415_v7  ;;  %v411_v8 = vpop.f32.mrb[2].mxu0 }
 0x179   : > { %v717_v9 = vpop.f32.mrb[3].mxu0 }
 0x205   : > { %v417_v12 = vpop.xlane.xlu0 %416 }
 0x206   : > { %v418_v13 = vmax.f32 %v414_v11, %v417_v12 }
 0x208   : > { %v419_v14 = vsub.f32 %v414_v11, %v418_v13  ;;  %496 = vst.msk [vmem:[#allocation2] sm:$0xff] %vm360_vm2, %v418_v13  ;;  %424 = vperm.xlu0 %827, %v418_v13  }
 0x20a   : > { %v420_v23 = vmul.f32 1.442695, %v419_v14 }
 0x287   : > { %v425_v17 = vpop.permute.xlu0 %424 }
 0x288   : > { %v427_v18 = vsub.f32 %v408_v5, %v425_v17 }
 0x28a   : > { %v428_v19 = vmul.f32 1.442695, %v427_v18 }
 0x28c   : > { %829 = vpow2.f32 %v428_v19 }
 0x28d   : > { %831 = vpow2.f32 %v420_v23 }
 0x296   : > { %v830_v20 = vpop.eup %829 }
 0x297   : > { %v432_v21 = vsel %vm363_vm0, %v830_v20, 0.0  ;;  %v445_v22 = vpack.c.bf16 %v830_v20, %v830_v20  ;;  %v832_v24 = vpop.eup %831 }
 0x298   : > { %433 = vadd.xlane.f32.xlu1 %v432_v21  ;;  %v431_v26 = vmul.f32 %v832_v24, %v430_v25 }
 0x299   : > { %721 = vmatmul.mubr.msk.bf16.vlgmr.msra.gmra.mrb[0].mxu1 %vm363_vm0, %v445_v22 }
 0x2a9   : > { %441 = vperm.xlu1 %828, %v832_v24  }
 0x325   : > { %v434_v27 = vpop.xlane.xlu1 %433 }
 0x326   : > { %v435_v28 = vadd.f32 %v434_v27, %v431_v26 }
 0x328   : > { %437 = vst.msk [vmem:[#allocation3] sm:$0xff] %vm360_vm2, %v435_v28 }
 0x329   : > { %v442_v32 = vpop.permute.xlu1 %441 }
 0x32a   : > { %v444_v33 = vmul.f32 %v442_v32, %v438_v31 }
 0x32f   : > { %v501_v29 = vld [vmem:[#allocation3] sm:$0xff] }
 0x330   : > { %833 = vrcp.f32 %v501_v29 }
 0x33a   : > { %v834_v30 = vpop.eup %833 }
 0x33b   : > { %505 = vperm.xlu1 %828, %v834_v30  }
 0x36c   : > { %v488_v34 = vpop.f32.mrb[0].mxu1 }
 0x36d   : > { %v494_v35 = vadd.f32 %v488_v34, %v444_v33  ;;  %v722_v36 = vpop.f32.mrb[1].mxu1 }
 0x36e   : > { %v491_v37 = vpop.f32.mrb[2].mxu1 }
 0x36f   : > { %495 = vst.msk [vmem:[#allocation4] sm:$0xff] %vm363_vm0, %v494_v35  ;;  %v723_v38 = vpop.f32.mrb[3].mxu1 }
 0x376   : > { %v500_v39 = vld [vmem:[#allocation4] sm:$0xff] }
 0x3ba   : > { %v506_v40 = vpop.permute.xlu1 %505 }
 0x3bb   : > { %v508_v41 = vmul.f32 %v506_v40, %v500_v39 }
 0x3bd   : > { %509 = vst.msk [vmem:[%s354_s23] sm:$0xff] %vm363_vm0, %v508_v41 }
 0x3be   : > { %966 = shalt.err (!%p963_p3)
}
 0x3bf   : > { %s967_s24 = scalar_lea.hbm %s1368_s1, 128  ;;  %s971_s5 = scalar_lea.hbm %s1427_s4, 1024 }
 0x3c0   : > { %p968_p4 = scmp.ne.s32.totalorder %s1368_s1, %s967_s24  ;;  %p972_p9 = scmp.lt.u32.totalorder %s1368_s1, %s1427_s4 }
 0x3c1   : > { %p973_p10 = scmp.lt.u32.totalorder %s971_s5, %s967_s24  ;;  %p975_p13 = scmp.lt.u32.totalorder %s967_s24, %s1368_s1 }
 0x3c2   : > { %p969_p12 = pnand %p968_p4, %p1470_p0 }
 0x3c3   : > { %p974_p1 = por %p973_p10, %p972_p9 }
 0x3c4   : > { %p970_p7 = pneg %p969_p12 }
 0x3c5   : > { %p976_p2 = por %p975_p13, %p974_p1 }
 0x3c7   : > { %p977_p5 = pnand %p976_p2, %p970_p7 }
 0x3c9   : > { %980 = shalt.err (!%p977_p5)
}
 0x3ca   : > { %734 = dma.vmem_to_hbm [thread:$0]  (%p1470_p0), %s1370_s11, 128, %s1368_s1, %s511_s19  }
 0x3cb PF: > { %s1471_s8 = sld [smem:[#allocation18_spill]]  ;;  %s1472_s29 = sld [smem:[#allocation25_spill]] }
 0x3cc   : > { %p757_p11 = scmp.ge.s32.totalorder %s1059_s22, 2 }
 0x3d1   : > { %s539_s9 = sand.u32 1, %s1471_s8   ;;  %p1473_p8 = scmp.ne.s32.totalorder %s1472_s29, 0 }
 0x3d2   : > { %s540_s20 = scalar_lea.sflag [#allocation7], %s539_s9 }
 0x3d3   : > { %p751_p6 = pnand %p757_p11, %p1473_p8 }
 0x3d5   : > { %1026 = dma.done.wait (!%p751_p6), %s540_s20, 128  }
 0x3d6   : > { %1028 = vsyncadd (!%p751_p6), %s540_s20, 4294967168  ;;  %s24_s22 = sadd.s32 1, %s1059_s22   ;;  %s1474_s30 = sld [smem:[#allocation19_spill]] }
 0x3d7   : > { %p21_p3 = scmp.ge.s32.totalorder %s24_s22, 10   ;;  %s1475_s17 = sld [smem:[#allocation24_spill]] }
 0x3d8   : > { %s1476_s18 = sld [smem:[#allocation20_spill]]  ;;  %s1477_s19 = sld [smem:[#allocation21_spill]] }
 0x3d9   : > { %s1478_s20 = sld [smem:[#allocation22_spill]]  ;;  %s1479_s21 = sld [smem:[#allocation23_spill]] }
 0x3da   : > { %s1480_s15 = smov %s1035_s16  ;;  %23 = sbr.rel (!%p21_p3) target bundleno = 12 (0xc), region = 118 }
 0x3dc   : > { %s1481_s16 = smov %s1474_s30 }
 0x3e1   :  { %545 = vsyncpa [#allocation6], 1 }
 0x3e2   :  { %547 = vsyncpa [#allocation6 + $0x1], 1 }
 0x3e3   :  { %548 = vsyncpa [#allocation9], 1 }
 0x3e4   :  { %550 = vsyncpa [#allocation9 + $0x1], 1 }
 0x3e5   :  { %551 = vsyncpa [#allocation12], 1 }
 0x3e6   :  { %552 = vsyncpa [#allocation7], 1 }
 0x3e7   :  { %554 = vsyncpa [#allocation7 + $0x1], 1 }

</bundles_post_ra>
